<compile_context>
chip_gen: v5e
topology: v5e:2x2
jax: 0.10.0
libtpu: 0.0.40
codegen_flags: <defaults>
</compile_context>

<pallas_src>
import math

import jax
import jax.numpy as jnp
from jax.experimental import pallas as pl
from jax.experimental.pallas import tpu as pltpu

D_MODEL = 32
HEADS = 4
HEAD_DIM = D_MODEL // HEADS
D_FF = 64
EPS = 1e-8        # RMSNorm eps = 10**-8, added AFTER the sqrt (as in the module)
NEG_INF = -1e9    # masked_fill value used by the module


def decoder_block_kernel(x_ref, madd_ref,
                         alpha1_ref, wq_ref, wk_ref, wv_ref, wf_ref,
                         alpha3_ref, w1_ref, b1_ref, w2_ref, b2_ref,
                         out_ref):
    # x_ref holds `batch_block` whole batch elements flattened to rows:
    # (T, D) with T = batch_block * S.  Every matmul below therefore sees T
    # rows instead of S rows per grid step.
    x = x_ref[...]                                              # (T, D) f32

    # ---- RMSNorm1:  alpha * x / (sqrt(mean(x^2)) + eps) ----
    ms = jnp.mean(jnp.square(x), axis=-1, keepdims=True)
    inv1 = pl.reciprocal(jnp.sqrt(ms) + EPS, approx=True)       # EUP slot
    n1 = alpha1_ref[...] * (x * inv1)

    # ---- Multi-head self-attention ----
    # 1/sqrt(head_dim) is already folded into wq by the wrapper.
    q = jnp.dot(n1, wq_ref[...], preferred_element_type=jnp.float32)
    k = jnp.dot(n1, wk_ref[...], preferred_element_type=jnp.float32)
    v = jnp.dot(n1, wv_ref[...], preferred_element_type=jnp.float32)

    # Head-major stacks (H, T, Hd): static 8-lane slices + leading-axis stack.
    def split_heads(z):
        return jnp.stack(
            [z[:, h * HEAD_DIM:(h + 1) * HEAD_DIM] for h in range(HEADS)],
            axis=0)

    qh, kh, vh = split_heads(q), split_heads(k), split_heads(v)

    # One batched contraction for all heads (and all batch rows of this step).
    s = jnp.einsum('hqd,hkd->hqk', qh, kh,
                   preferred_element_type=jnp.float32)          # (H, T, T)
    # Additive mask (precomputed in wrapper): causal -1e9 inside each batch
    # block, -1e9 for every cross-batch pair.  Broadcasts over heads.
    s = s + madd_ref[...]
    s = s - jnp.max(s, axis=-1, keepdims=True)                  # stable softmax
    p = jnp.exp(s)
    p = p * pl.reciprocal(jnp.sum(p, axis=-1, keepdims=True), approx=True)
    # TODO(synk): attention-probability dropout (p=0.1) omitted (eval mode).
    ctx = jnp.einsum('hqk,hkd->hqd', p, vh,
                     preferred_element_type=jnp.float32)        # (H, T, Hd)
    ctx2 = jnp.concatenate([ctx[h] for h in range(HEADS)], axis=-1)  # (T, D)

    attn = jnp.dot(ctx2, wf_ref[...], preferred_element_type=jnp.float32)

    # residual 1 (dropout1 = identity in eval mode)
    x1 = x + attn

    # ---- RMSNorm3 + FeedForward (SiLU) ----
    ms3 = jnp.mean(jnp.square(x1), axis=-1, keepdims=True)
    inv3 = pl.reciprocal(jnp.sqrt(ms3) + EPS, approx=True)
    n3 = alpha3_ref[...] * (x1 * inv3)
    h1 = jnp.dot(n3, w1_ref[...], preferred_element_type=jnp.float32) + b1_ref[...]
    h1 = h1 * jax.nn.sigmoid(h1)                                # SiLU
    ff = jnp.dot(h1, w2_ref[...], preferred_element_type=jnp.float32) + b2_ref[...]

    # residual 2 (dropout3 = identity in eval mode).
    # NOTE: D=32 => a 32-lane (masked) store, but the whole output is only
    # ~2 vregs; relayouting to a 128-lane-dense shape in-kernel would cost as
    # much as the masked store it removes, so it is intentionally not done.
    out_ref[...] = x1 + ff


def decoder_block(x, mask, params, *, batch_block=None):
    """DecoderBlock forward.  x: (B, S, D) f32, mask: (S, S), 0 == masked."""
    B, S, D = x.shape
    assert D == D_MODEL
    assert mask.shape == (S, S)

    # Batch elements per grid step.  Default: all of them (single grid step ->
    # no per-step pipeline overhead on v5e/v6e).  On v7x (2 TensorCores) use
    # batch_block = B // 2 so both cores get one "parallel" step each.
    bb = B if batch_block is None else batch_block
    assert B % bb == 0
    T = bb * S                                     # rows per grid step

    # ---- wrapper-side (plain JAX) preprocessing, hoisted out of the kernel ----
    # Fold the 1/sqrt(head_dim) attention scale into the query projection.
    wq_s = params["wq"] * jnp.float32(1.0 / math.sqrt(HEAD_DIM))
    # Additive attention mask for one grid step: causal(-1e9) inside each of
    # the `bb` batch blocks, -1e9 everywhere cross-batch (kills the scores
    # between tokens of different batch elements flattened into the T rows).
    neg = jnp.where(mask == 0, jnp.float32(NEG_INF), jnp.float32(0.0))  # (S,S)
    bid = jnp.repeat(jnp.arange(bb), S)
    same_batch = bid[:, None] == bid[None, :]                           # (T,T)
    mask_add = jnp.where(same_batch, jnp.tile(neg, (bb, bb)),
                         jnp.float32(NEG_INF)).astype(jnp.float32)      # (T,T)

    # Flatten batch into rows outside the kernel (layout-preserving).
    xf = x.reshape(B * S, D)

    def fixed(shape):
        return pl.BlockSpec(shape, lambda i: tuple(0 for _ in shape))

    in_specs = [
        pl.BlockSpec((T, D), lambda i: (i, 0)),   # x (bb batches per step)
        fixed((T, T)),                            # additive mask
        fixed((1, D)),                            # alpha1
        fixed((D, D)),                            # wq (scale folded in)
        fixed((D, D)),                            # wk
        fixed((D, D)),                            # wv
        fixed((D, D)),                            # wf
        fixed((1, D)),                            # alpha3
        fixed((D, D_FF)),                         # w1
        fixed((1, D_FF)),                         # b1
        fixed((D_FF, D)),                         # w2
        fixed((1, D)),                            # b2
    ]
    out_specs = pl.BlockSpec((T, D), lambda i: (i, 0))

    out_flat = pl.pallas_call(
        decoder_block_kernel,
        out_shape=jax.ShapeDtypeStruct((B * S, D), jnp.float32),
        grid=(B // bb,),
        in_specs=in_specs,
        out_specs=out_specs,
        compiler_params=pltpu.CompilerParams(dimension_semantics=("parallel",)),
    )(xf, mask_add,
      params["alpha1"], wq_s, params["wk"], params["wv"], params["wf"],
      params["alpha3"], params["w1"], params["b1"], params["w2"], params["b2"])
    return out_flat.reshape(B, S, D)


# ---------------- pure-JAX reference (for correctness check) ----------------
def ref_decoder_block(x, mask, p):
    def rms(z, alpha):
        ms = jnp.mean(jnp.square(z), axis=-1, keepdims=True)
        return alpha * (z / (jnp.sqrt(ms) + EPS))

    B, S, D = x.shape
    norm = rms(x, p["alpha1"][0])
    q = norm @ p["wq"]
    k = norm @ p["wk"]
    v = norm @ p["wv"]
    qh = q.reshape(B, S, HEADS, HEAD_DIM).transpose(0, 2, 1, 3)
    kh = k.reshape(B, S, HEADS, HEAD_DIM).transpose(0, 2, 1, 3)
    vh = v.reshape(B, S, HEADS, HEAD_DIM).transpose(0, 2, 1, 3)
    s = jnp.einsum("bhqd,bhkd->bhqk", qh, kh) / math.sqrt(HEAD_DIM)
    s = jnp.where(mask == 0, NEG_INF, s)
    pr = jax.nn.softmax(s, axis=-1)
    ctx = jnp.einsum("bhqk,bhkd->bhqd", pr, vh).transpose(0, 2, 1, 3).reshape(B, S, D)
    attn = ctx @ p["wf"]
    x1 = x + attn
    norm3 = rms(x1, p["alpha3"][0])
    h1 = norm3 @ p["w1"] + p["b1"][0]
    h1 = h1 * jax.nn.sigmoid(h1)
    ff = h1 @ p["w2"] + p["b2"][0]
    return x1 + ff


if __name__ == "__main__":
    B, S = 2, 8

    key = jax.random.PRNGKey(0)
    keys = jax.random.split(key, 8)

    params = {
        "alpha1": jnp.ones((1, D_MODEL), jnp.float32),                            # RMSNorm1 alpha
        "wq": 0.05 * jax.random.normal(keys[0], (D_MODEL, D_MODEL), jnp.float32),
        "wk": 0.05 * jax.random.normal(keys[1], (D_MODEL, D_MODEL), jnp.float32),
        "wv": 0.05 * jax.random.normal(keys[2], (D_MODEL, D_MODEL), jnp.float32),
        "wf": 0.05 * jax.random.normal(keys[3], (D_MODEL, D_MODEL), jnp.float32),
        "alpha3": jnp.ones((1, D_MODEL), jnp.float32),                            # RMSNorm3 alpha
        "w1": 0.05 * jax.random.normal(keys[4], (D_MODEL, D_FF), jnp.float32),
        "b1": 0.01 * jax.random.normal(keys[5], (1, D_FF), jnp.float32),
        "w2": 0.05 * jax.random.normal(keys[6], (D_FF, D_MODEL), jnp.float32),
        "b2": 0.01 * jax.random.normal(keys[7], (1, D_MODEL), jnp.float32),
    }

    xkey = jax.random.PRNGKey(42)
    x = jax.random.normal(xkey, (B, S, D_MODEL), jnp.float32)

    # causal target mask: 1 = keep, 0 = masked (as in masked_fill(mask == 0, -1e9))
    tgt_mask = jnp.tril(jnp.ones((S, S), jnp.float32))

    # freqs_complex_form is unused by the reference forward; ignored here.
    out = decoder_block(x, tgt_mask, params)
    out = jax.block_until_ready(out)

    ref = ref_decoder_block(x, tgt_mask, params)
    assert out.shape == (B, S, D_MODEL)
    # Tolerance relaxed slightly vs. exact-divide version because the kernel
    # uses pl.reciprocal(approx=True) for the RMSNorm / softmax denominators.
    assert jnp.allclose(out, ref, atol=2e-3, rtol=2e-3), "mismatch vs JAX reference"

    print("KERNEL_OK")
</pallas_src>

<mosaic_0001>
module attributes {stable_mosaic.version = 11 : i64} {
  func.func @decoder_block_kernel(%arg0: i32, %arg1: memref<16x32xf32, #tpu.memory_space<vmem>>, %arg2: memref<16x16xf32, #tpu.memory_space<vmem>>, %arg3: memref<1x32xf32, #tpu.memory_space<vmem>>, %arg4: memref<32x32xf32, #tpu.memory_space<vmem>>, %arg5: memref<32x32xf32, #tpu.memory_space<vmem>>, %arg6: memref<32x32xf32, #tpu.memory_space<vmem>>, %arg7: memref<32x32xf32, #tpu.memory_space<vmem>>, %arg8: memref<1x32xf32, #tpu.memory_space<vmem>>, %arg9: memref<32x64xf32, #tpu.memory_space<vmem>>, %arg10: memref<1x64xf32, #tpu.memory_space<vmem>>, %arg11: memref<64x32xf32, #tpu.memory_space<vmem>>, %arg12: memref<1x32xf32, #tpu.memory_space<vmem>>, %arg13: memref<16x32xf32, #tpu.memory_space<vmem>>) attributes {dimension_semantics = [#tpu.dimension_semantics<parallel>], iteration_bounds = array<i64: 1>, scalar_prefetch = 0 : i64, scratch_operands = 0 : i64, tpu.core_type = #tpu.core_type<tc>, window_params = [{transform_indices = @transform_0, window_bounds = array<i64: 16, 32>}, {pipeline_mode = #tpu.pipeline_mode<synchronous>, transform_indices = @transform_1, window_bounds = array<i64: 16, 16>}, {pipeline_mode = #tpu.pipeline_mode<synchronous>, transform_indices = @transform_2, window_bounds = array<i64: 1, 32>}, {pipeline_mode = #tpu.pipeline_mode<synchronous>, transform_indices = @transform_3, window_bounds = array<i64: 32, 32>}, {pipeline_mode = #tpu.pipeline_mode<synchronous>, transform_indices = @transform_4, window_bounds = array<i64: 32, 32>}, {pipeline_mode = #tpu.pipeline_mode<synchronous>, transform_indices = @transform_5, window_bounds = array<i64: 32, 32>}, {pipeline_mode = #tpu.pipeline_mode<synchronous>, transform_indices = @transform_6, window_bounds = array<i64: 32, 32>}, {pipeline_mode = #tpu.pipeline_mode<synchronous>, transform_indices = @transform_7, window_bounds = array<i64: 1, 32>}, {pipeline_mode = #tpu.pipeline_mode<synchronous>, transform_indices = @transform_8, window_bounds = array<i64: 32, 64>}, {pipeline_mode = #tpu.pipeline_mode<synchronous>, transform_indices = @transform_9, window_bounds = array<i64: 1, 64>}, {pipeline_mode = #tpu.pipeline_mode<synchronous>, transform_indices = @transform_10, window_bounds = array<i64: 64, 32>}, {pipeline_mode = #tpu.pipeline_mode<synchronous>, transform_indices = @transform_11, window_bounds = array<i64: 1, 32>}, {transform_indices = @transform_12, window_bounds = array<i64: 16, 32>}]} {
    %c0 = arith.constant 0 : index
    %c0_0 = arith.constant 0 : index
    %0 = vector.load %arg1[%c0, %c0_0] : memref<16x32xf32, #tpu.memory_space<vmem>>, vector<16x32xf32>
    %1 = arith.mulf %0, %0 : vector<16x32xf32>
    %cst = arith.constant dense<0.000000e+00> : vector<16xf32>
    %2 = vector.multi_reduction <add>, %1, %cst [1] : vector<16x32xf32> to vector<16xf32>
    %3 = vector.shape_cast %2 : vector<16xf32> to vector<16x1xf32>
    %cst_1 = arith.constant 3.200000e+01 : f32
    %4 = vector.broadcast %cst_1 : f32 to vector<16x1xf32>
    %5 = arith.divf %3, %4 : vector<16x1xf32>
    %6 = math.sqrt %5 : vector<16x1xf32>
    %cst_2 = arith.constant 9.99999993E-9 : f32
    %7 = vector.broadcast %cst_2 : f32 to vector<16x1xf32>
    %8 = arith.addf %6, %7 : vector<16x1xf32>
    %9 = tpu.reciprocal %8 {approx = true} : vector<16x1xf32> -> vector<16x1xf32>
    %c0_3 = arith.constant 0 : index
    %c0_4 = arith.constant 0 : index
    %10 = vector.load %arg3[%c0_3, %c0_4] : memref<1x32xf32, #tpu.memory_space<vmem>>, vector<1x32xf32>
    %11 = vector.broadcast %9 : vector<16x1xf32> to vector<16x32xf32>
    %12 = arith.mulf %0, %11 : vector<16x32xf32>
    %13 = vector.broadcast %10 : vector<1x32xf32> to vector<16x32xf32>
    %14 = arith.mulf %13, %12 : vector<16x32xf32>
    %c0_5 = arith.constant 0 : index
    %c0_6 = arith.constant 0 : index
    %15 = vector.load %arg4[%c0_5, %c0_6] : memref<32x32xf32, #tpu.memory_space<vmem>>, vector<32x32xf32>
    %cst_7 = arith.constant dense<0.000000e+00> : vector<16x32xf32>
    %16 = tpu.matmul %14, %15, %cst_7 {dimension_numbers = #tpu.dot_dimension_numbers<[1], [0], [0], [1], [0, 0, 1, 1], [], []>} : vector<16x32xf32>, vector<32x32xf32>, vector<16x32xf32> -> vector<16x32xf32>
    %c0_8 = arith.constant 0 : index
    %c0_9 = arith.constant 0 : index
    %17 = vector.load %arg5[%c0_8, %c0_9] : memref<32x32xf32, #tpu.memory_space<vmem>>, vector<32x32xf32>
    %cst_10 = arith.constant dense<0.000000e+00> : vector<16x32xf32>
    %18 = tpu.matmul %14, %17, %cst_10 {dimension_numbers = #tpu.dot_dimension_numbers<[1], [0], [0], [1], [0, 0, 1, 1], [], []>} : vector<16x32xf32>, vector<32x32xf32>, vector<16x32xf32> -> vector<16x32xf32>
    %c0_11 = arith.constant 0 : index
    %c0_12 = arith.constant 0 : index
    %19 = vector.load %arg6[%c0_11, %c0_12] : memref<32x32xf32, #tpu.memory_space<vmem>>, vector<32x32xf32>
    %cst_13 = arith.constant dense<0.000000e+00> : vector<16x32xf32>
    %20 = tpu.matmul %14, %19, %cst_13 {dimension_numbers = #tpu.dot_dimension_numbers<[1], [0], [0], [1], [0, 0, 1, 1], [], []>} : vector<16x32xf32>, vector<32x32xf32>, vector<16x32xf32> -> vector<16x32xf32>
    %21 = vector.extract_strided_slice %16 {offsets = [0, 0], sizes = [16, 8], strides = [1, 1]} : vector<16x32xf32> to vector<16x8xf32>
    %22 = vector.extract_strided_slice %16 {offsets = [0, 8], sizes = [16, 8], strides = [1, 1]} : vector<16x32xf32> to vector<16x8xf32>
    %23 = vector.extract_strided_slice %16 {offsets = [0, 16], sizes = [16, 8], strides = [1, 1]} : vector<16x32xf32> to vector<16x8xf32>
    %24 = vector.extract_strided_slice %16 {offsets = [0, 24], sizes = [16, 8], strides = [1, 1]} : vector<16x32xf32> to vector<16x8xf32>
    %25 = vector.shape_cast %21 : vector<16x8xf32> to vector<1x16x8xf32>
    %26 = vector.shape_cast %22 : vector<16x8xf32> to vector<1x16x8xf32>
    %27 = vector.shape_cast %23 : vector<16x8xf32> to vector<1x16x8xf32>
    %28 = vector.shape_cast %24 : vector<16x8xf32> to vector<1x16x8xf32>
    %29 = tpu.concatenate %25, %26, %27, %28 in 0 : vector<1x16x8xf32>, vector<1x16x8xf32>, vector<1x16x8xf32>, vector<1x16x8xf32> -> vector<4x16x8xf32>
    %30 = vector.extract_strided_slice %18 {offsets = [0, 0], sizes = [16, 8], strides = [1, 1]} : vector<16x32xf32> to vector<16x8xf32>
    %31 = vector.extract_strided_slice %18 {offsets = [0, 8], sizes = [16, 8], strides = [1, 1]} : vector<16x32xf32> to vector<16x8xf32>
    %32 = vector.extract_strided_slice %18 {offsets = [0, 16], sizes = [16, 8], strides = [1, 1]} : vector<16x32xf32> to vector<16x8xf32>
    %33 = vector.extract_strided_slice %18 {offsets = [0, 24], sizes = [16, 8], strides = [1, 1]} : vector<16x32xf32> to vector<16x8xf32>
    %34 = vector.shape_cast %30 : vector<16x8xf32> to vector<1x16x8xf32>
    %35 = vector.shape_cast %31 : vector<16x8xf32> to vector<1x16x8xf32>
    %36 = vector.shape_cast %32 : vector<16x8xf32> to vector<1x16x8xf32>
    %37 = vector.shape_cast %33 : vector<16x8xf32> to vector<1x16x8xf32>
    %38 = tpu.concatenate %34, %35, %36, %37 in 0 : vector<1x16x8xf32>, vector<1x16x8xf32>, vector<1x16x8xf32>, vector<1x16x8xf32> -> vector<4x16x8xf32>
    %39 = vector.extract_strided_slice %20 {offsets = [0, 0], sizes = [16, 8], strides = [1, 1]} : vector<16x32xf32> to vector<16x8xf32>
    %40 = vector.extract_strided_slice %20 {offsets = [0, 8], sizes = [16, 8], strides = [1, 1]} : vector<16x32xf32> to vector<16x8xf32>
    %41 = vector.extract_strided_slice %20 {offsets = [0, 16], sizes = [16, 8], strides = [1, 1]} : vector<16x32xf32> to vector<16x8xf32>
    %42 = vector.extract_strided_slice %20 {offsets = [0, 24], sizes = [16, 8], strides = [1, 1]} : vector<16x32xf32> to vector<16x8xf32>
    %43 = vector.shape_cast %39 : vector<16x8xf32> to vector<1x16x8xf32>
    %44 = vector.shape_cast %40 : vector<16x8xf32> to vector<1x16x8xf32>
    %45 = vector.shape_cast %41 : vector<16x8xf32> to vector<1x16x8xf32>
    %46 = vector.shape_cast %42 : vector<16x8xf32> to vector<1x16x8xf32>
    %47 = tpu.concatenate %43, %44, %45, %46 in 0 : vector<1x16x8xf32>, vector<1x16x8xf32>, vector<1x16x8xf32>, vector<1x16x8xf32> -> vector<4x16x8xf32>
    "tpu.trace_start"() <{level = 10 : i32, message = "hqd,hkd->hqk"}> : () -> ()
    %cst_14 = arith.constant dense<0.000000e+00> : vector<4x16x16xf32>
    %48 = tpu.matmul %29, %38, %cst_14 {dimension_numbers = #tpu.dot_dimension_numbers<[2], [2], [1], [1], [0, 0, 0, 1, 1, 1], [0], [0]>} : vector<4x16x8xf32>, vector<4x16x8xf32>, vector<4x16x16xf32> -> vector<4x16x16xf32>
    "tpu.trace_stop"() : () -> ()
    %c0_15 = arith.constant 0 : index
    %c0_16 = arith.constant 0 : index
    %49 = vector.load %arg2[%c0_15, %c0_16] : memref<16x16xf32, #tpu.memory_space<vmem>>, vector<16x16xf32>
    %50 = vector.shape_cast %49 : vector<16x16xf32> to vector<1x16x16xf32>
    %51 = vector.broadcast %50 : vector<1x16x16xf32> to vector<4x16x16xf32>
    %52 = arith.addf %48, %51 : vector<4x16x16xf32>
    %cst_17 = arith.constant dense<0xFF800000> : vector<4x16xf32>
    %53 = vector.multi_reduction <maximumf>, %52, %cst_17 [2] : vector<4x16x16xf32> to vector<4x16xf32>
    %54 = vector.shape_cast %53 : vector<4x16xf32> to vector<4x16x1xf32>
    %55 = vector.broadcast %54 : vector<4x16x1xf32> to vector<4x16x16xf32>
    %56 = arith.subf %52, %55 : vector<4x16x16xf32>
    %57 = math.exp %56 : vector<4x16x16xf32>
    %cst_18 = arith.constant dense<0.000000e+00> : vector<4x16xf32>
    %58 = vector.multi_reduction <add>, %57, %cst_18 [2] : vector<4x16x16xf32> to vector<4x16xf32>
    %59 = vector.shape_cast %58 : vector<4x16xf32> to vector<4x16x1xf32>
    %60 = tpu.reciprocal %59 {approx = true} : vector<4x16x1xf32> -> vector<4x16x1xf32>
    %61 = vector.broadcast %60 : vector<4x16x1xf32> to vector<4x16x16xf32>
    %62 = arith.mulf %57, %61 : vector<4x16x16xf32>
    "tpu.trace_start"() <{level = 10 : i32, message = "hqk,hkd->hqd"}> : () -> ()
    %cst_19 = arith.constant dense<0.000000e+00> : vector<4x16x8xf32>
    %63 = tpu.matmul %62, %47, %cst_19 {dimension_numbers = #tpu.dot_dimension_numbers<[2], [1], [1], [2], [0, 0, 0, 1, 1, 2], [0], [0]>} : vector<4x16x16xf32>, vector<4x16x8xf32>, vector<4x16x8xf32> -> vector<4x16x8xf32>
    "tpu.trace_stop"() : () -> ()
    %64 = vector.extract_strided_slice %63 {offsets = [0, 0, 0], sizes = [1, 16, 8], strides = [1, 1, 1]} : vector<4x16x8xf32> to vector<1x16x8xf32>
    %65 = vector.shape_cast %64 : vector<1x16x8xf32> to vector<16x8xf32>
    %66 = vector.extract_strided_slice %63 {offsets = [1, 0, 0], sizes = [1, 16, 8], strides = [1, 1, 1]} : vector<4x16x8xf32> to vector<1x16x8xf32>
    %67 = vector.shape_cast %66 : vector<1x16x8xf32> to vector<16x8xf32>
    %68 = vector.extract_strided_slice %63 {offsets = [2, 0, 0], sizes = [1, 16, 8], strides = [1, 1, 1]} : vector<4x16x8xf32> to vector<1x16x8xf32>
    %69 = vector.shape_cast %68 : vector<1x16x8xf32> to vector<16x8xf32>
    %70 = vector.extract_strided_slice %63 {offsets = [3, 0, 0], sizes = [1, 16, 8], strides = [1, 1, 1]} : vector<4x16x8xf32> to vector<1x16x8xf32>
    %71 = vector.shape_cast %70 : vector<1x16x8xf32> to vector<16x8xf32>
    %72 = tpu.concatenate %65, %67, %69, %71 in 1 : vector<16x8xf32>, vector<16x8xf32>, vector<16x8xf32>, vector<16x8xf32> -> vector<16x32xf32>
    %c0_20 = arith.constant 0 : index
    %c0_21 = arith.constant 0 : index
    %73 = vector.load %arg7[%c0_20, %c0_21] : memref<32x32xf32, #tpu.memory_space<vmem>>, vector<32x32xf32>
    %cst_22 = arith.constant dense<0.000000e+00> : vector<16x32xf32>
    %74 = tpu.matmul %72, %73, %cst_22 {dimension_numbers = #tpu.dot_dimension_numbers<[1], [0], [0], [1], [0, 0, 1, 1], [], []>} : vector<16x32xf32>, vector<32x32xf32>, vector<16x32xf32> -> vector<16x32xf32>
    %75 = arith.addf %0, %74 : vector<16x32xf32>
    %76 = arith.mulf %75, %75 : vector<16x32xf32>
    %cst_23 = arith.constant dense<0.000000e+00> : vector<16xf32>
    %77 = vector.multi_reduction <add>, %76, %cst_23 [1] : vector<16x32xf32> to vector<16xf32>
    %78 = vector.shape_cast %77 : vector<16xf32> to vector<16x1xf32>
    %cst_24 = arith.constant 3.200000e+01 : f32
    %79 = vector.broadcast %cst_24 : f32 to vector<16x1xf32>
    %80 = arith.divf %78, %79 : vector<16x1xf32>
    %81 = math.sqrt %80 : vector<16x1xf32>
    %cst_25 = arith.constant 9.99999993E-9 : f32
    %82 = vector.broadcast %cst_25 : f32 to vector<16x1xf32>
    %83 = arith.addf %81, %82 : vector<16x1xf32>
    %84 = tpu.reciprocal %83 {approx = true} : vector<16x1xf32> -> vector<16x1xf32>
    %c0_26 = arith.constant 0 : index
    %c0_27 = arith.constant 0 : index
    %85 = vector.load %arg8[%c0_26, %c0_27] : memref<1x32xf32, #tpu.memory_space<vmem>>, vector<1x32xf32>
    %86 = vector.broadcast %84 : vector<16x1xf32> to vector<16x32xf32>
    %87 = arith.mulf %75, %86 : vector<16x32xf32>
    %88 = vector.broadcast %85 : vector<1x32xf32> to vector<16x32xf32>
    %89 = arith.mulf %88, %87 : vector<16x32xf32>
    %c0_28 = arith.constant 0 : index
    %c0_29 = arith.constant 0 : index
    %90 = vector.load %arg9[%c0_28, %c0_29] : memref<32x64xf32, #tpu.memory_space<vmem>>, vector<32x64xf32>
    %cst_30 = arith.constant dense<0.000000e+00> : vector<16x64xf32>
    %91 = tpu.matmul %89, %90, %cst_30 {dimension_numbers = #tpu.dot_dimension_numbers<[1], [0], [0], [1], [0, 0, 1, 1], [], []>} : vector<16x32xf32>, vector<32x64xf32>, vector<16x64xf32> -> vector<16x64xf32>
    %c0_31 = arith.constant 0 : index
    %c0_32 = arith.constant 0 : index
    %92 = vector.load %arg10[%c0_31, %c0_32] : memref<1x64xf32, #tpu.memory_space<vmem>>, vector<1x64xf32>
    %93 = vector.broadcast %92 : vector<1x64xf32> to vector<16x64xf32>
    %94 = arith.addf %91, %93 : vector<16x64xf32>
    %95 = arith.negf %94 : vector<16x64xf32>
    %96 = math.exp %95 : vector<16x64xf32>
    %cst_33 = arith.constant 1.000000e+00 : f32
    %97 = vector.broadcast %cst_33 : f32 to vector<16x64xf32>
    %98 = arith.addf %97, %96 : vector<16x64xf32>
    %99 = arith.divf %97, %98 : vector<16x64xf32>
    %100 = arith.mulf %94, %99 : vector<16x64xf32>
    %c0_34 = arith.constant 0 : index
    %c0_35 = arith.constant 0 : index
    %101 = vector.load %arg11[%c0_34, %c0_35] : memref<64x32xf32, #tpu.memory_space<vmem>>, vector<64x32xf32>
    %cst_36 = arith.constant dense<0.000000e+00> : vector<16x32xf32>
    %102 = tpu.matmul %100, %101, %cst_36 {dimension_numbers = #tpu.dot_dimension_numbers<[1], [0], [0], [1], [0, 0, 1, 1], [], []>} : vector<16x64xf32>, vector<64x32xf32>, vector<16x32xf32> -> vector<16x32xf32>
    %c0_37 = arith.constant 0 : index
    %c0_38 = arith.constant 0 : index
    %103 = vector.load %arg12[%c0_37, %c0_38] : memref<1x32xf32, #tpu.memory_space<vmem>>, vector<1x32xf32>
    %104 = vector.broadcast %103 : vector<1x32xf32> to vector<16x32xf32>
    %105 = arith.addf %102, %104 : vector<16x32xf32>
    %106 = arith.addf %75, %105 : vector<16x32xf32>
    %c0_39 = arith.constant 0 : index
    %c0_40 = arith.constant 0 : index
    %107 = vector.load %arg13[%c0_39, %c0_40] : memref<16x32xf32, #tpu.memory_space<vmem>>, vector<16x32xf32>
    tpu.vector_store %arg13[%c0_39, %c0_40], %106 {strides = array<i32>} : memref<16x32xf32, #tpu.memory_space<vmem>>, vector<16x32xf32>,
    return
  }
  func.func @transform_0(%arg0: i32) -> (i32, i32) {
    %c0_i32 = arith.constant 0 : i32
    %c0_i32_0 = arith.constant 0 : i32
    return %arg0, %c0_i32 : i32, i32
  }
  func.func @transform_1(%arg0: i32) -> (i32, i32) {
    %c0_i32 = arith.constant 0 : i32
    %c0_i32_0 = arith.constant 0 : i32
    %c0_i32_1 = arith.constant 0 : i32
    return %c0_i32, %c0_i32_0 : i32, i32
  }
  func.func @transform_2(%arg0: i32) -> (i32, i32) {
    %c0_i32 = arith.constant 0 : i32
    %c0_i32_0 = arith.constant 0 : i32
    %c0_i32_1 = arith.constant 0 : i32
    return %c0_i32, %c0_i32_0 : i32, i32
  }
  func.func @transform_3(%arg0: i32) -> (i32, i32) {
    %c0_i32 = arith.constant 0 : i32
    %c0_i32_0 = arith.constant 0 : i32
    %c0_i32_1 = arith.constant 0 : i32
    return %c0_i32, %c0_i32_0 : i32, i32
  }
  func.func @transform_4(%arg0: i32) -> (i32, i32) {
    %c0_i32 = arith.constant 0 : i32
    %c0_i32_0 = arith.constant 0 : i32
    %c0_i32_1 = arith.constant 0 : i32
    return %c0_i32, %c0_i32_0 : i32, i32
  }
  func.func @transform_5(%arg0: i32) -> (i32, i32) {
    %c0_i32 = arith.constant 0 : i32
    %c0_i32_0 = arith.constant 0 : i32
    %c0_i32_1 = arith.constant 0 : i32
    return %c0_i32, %c0_i32_0 : i32, i32
  }
  func.func @transform_6(%arg0: i32) -> (i32, i32) {
    %c0_i32 = arith.constant 0 : i32
    %c0_i32_0 = arith.constant 0 : i32
    %c0_i32_1 = arith.constant 0 : i32
    return %c0_i32, %c0_i32_0 : i32, i32
  }
  func.func @transform_7(%arg0: i32) -> (i32, i32) {
    %c0_i32 = arith.constant 0 : i32
    %c0_i32_0 = arith.constant 0 : i32
    %c0_i32_1 = arith.constant 0 : i32
    return %c0_i32, %c0_i32_0 : i32, i32
  }
  func.func @transform_8(%arg0: i32) -> (i32, i32) {
    %c0_i32 = arith.constant 0 : i32
    %c0_i32_0 = arith.constant 0 : i32
    %c0_i32_1 = arith.constant 0 : i32
    return %c0_i32, %c0_i32_0 : i32, i32
  }
  func.func @transform_9(%arg0: i32) -> (i32, i32) {
    %c0_i32 = arith.constant 0 : i32
    %c0_i32_0 = arith.constant 0 : i32
    %c0_i32_1 = arith.constant 0 : i32
    return %c0_i32, %c0_i32_0 : i32, i32
  }
  func.func @transform_10(%arg0: i32) -> (i32, i32) {
    %c0_i32 = arith.constant 0 : i32
    %c0_i32_0 = arith.constant 0 : i32
    %c0_i32_1 = arith.constant 0 : i32
    return %c0_i32, %c0_i32_0 : i32, i32
  }
  func.func @transform_11(%arg0: i32) -> (i32, i32) {
    %c0_i32 = arith.constant 0 : i32
    %c0_i32_0 = arith.constant 0 : i32
    %c0_i32_1 = arith.constant 0 : i32
    return %c0_i32, %c0_i32_0 : i32, i32
  }
  func.func @transform_12(%arg0: i32) -> (i32, i32) {
    %c0_i32 = arith.constant 0 : i32
    %c0_i32_0 = arith.constant 0 : i32
    return %arg0, %c0_i32 : i32, i32
  }
}

</mosaic_0001>

<bundles_post_ra>
// kernel: tpu_custom_call.1
= control target key start
LH: loop header
LB: loop body
LE: loop exit
PB: predicated region body
PF: predicated region fallthrough
CT: control target
= control target key end

     0   :  { %17 = vsyncpa [#allocation3], 0  ;;  %s1465_s0 = inlined_call_operand.hbm [shape: f32[16,32], index: 0, kind: input, shape index: {}]   ;;  %s1466_s1 = inlined_call_operand.hbm [shape: f32[16,16], index: 1, kind: input, shape index: {}]   ;;  %s1467_s2 = inlined_call_operand.vmem [shape: f32[1,32], index: 2, kind: input, shape index: {}]   ;;  %s1468_s3 = inlined_call_operand.vmem [shape: f32[32,32], index: 3, kind: input, shape index: {}]   ;;  %s1469_s4 = inlined_call_operand.vmem [shape: f32[32,32], index: 4, kind: input, shape index: {}]   ;;  %s1470_s5 = inlined_call_operand.vmem [shape: f32[32,32], index: 5, kind: input, shape index: {}]   ;;  %s1471_s6 = inlined_call_operand.hbm [shape: f32[32,32], index: 6, kind: input, shape index: {}]   ;;  %s1472_s7 = inlined_call_operand.vmem [shape: f32[1,32], index: 7, kind: input, shape index: {}]   ;;  %s1473_s8 = inlined_call_operand.hbm [shape: f32[32,64], index: 8, kind: input, shape index: {}]   ;;  %s1474_s9 = inlined_call_operand.vmem [shape: f32[1,64], index: 9, kind: input, shape index: {}]   ;;  %s1475_s10 = inlined_call_operand.vmem [shape: f32[64,32], index: 10, kind: input, shape index: {}]   ;;  %s1476_s11 = inlined_call_operand.vmem [shape: f32[1,32], index: 11, kind: input, shape index: {}]   ;;  %s1477_s12 = inlined_call_operand.hbm [shape: f32[16,32], index: 12, kind: output, shape index: {}]  }
   0x1   :  { %18 = vsyncpa [#allocation6], 0 }
   0x2   :  { %19 = vsyncpa [#allocation9], 0 }
   0x3   :  { %20 = vsyncpa [#allocation4], 0  ;;  %s38_s23 = sshll.u32 %s1466_s1, 4  ;;  %s1148_s24 = smov [#allocation5]   ;;  %s39_s23 = int_to_ptr.hbm [resolvable:$true] %s38_s23 }
   0x4   :  { %s40_s25 = sshll.u32 %s1148_s24, 4  ;;  %s25_s28 = sshll.u32 %s1465_s0, 4  ;;  %s41_s25 = int_to_ptr.vmem [resolvable:$true] %s40_s25  ;;  %s26_s28 = int_to_ptr.hbm [resolvable:$true] %s25_s28 }
   0x5   :  { %s1149_s29 = smov 128   ;;  %s1150_s30 = smov 8  }
   0x6   :  { %46 = dma.hbm_to_vmem [thread:$0]  %s39_s23, 256, %s41_s25, [#allocation6], %s1149_s29, %s1149_s29, %s1150_s30  }
   0x7   :  { %s1151_s13 = smov [#allocation2]   ;;  %s59_s1 = sshll.u32 %s1471_s6, 4  ;;  %s60_s1 = int_to_ptr.hbm [resolvable:$true] %s59_s1 }
   0x8   :  { %s27_s14 = sshll.u32 %s1151_s13, 4  ;;  %s74_s18 = sshll.u32 %s1473_s8, 4  ;;  %s28_s14 = int_to_ptr.vmem [resolvable:$true] %s27_s14  ;;  %s75_s18 = int_to_ptr.hbm [resolvable:$true] %s74_s18 }
   0x9   :  { %33 = dma.hbm_to_vmem [thread:$0]  %s26_s28, 256, %s28_s14, [#allocation3], %s1149_s29, %s1149_s29, %s1150_s30  }
   0xa   :  { %s1152_s19 = smov [#allocation7]   ;;  %s1153_s21 = smov [#allocation8]  }
   0xb   :  { %s61_s20 = sshll.u32 %s1152_s19, 4  ;;  %s76_s6 = sshll.u32 %s1153_s21, 4  ;;  %s62_s20 = int_to_ptr.vmem [resolvable:$true] %s61_s20  ;;  %s77_s6 = int_to_ptr.vmem [resolvable:$true] %s76_s6 }
   0xc   :  { %67 = dma.hbm_to_vmem [thread:$0]  %s60_s1, 512, %s62_s20, [#allocation6], %s1149_s29, %s1149_s29, %s1150_s30  }
   0xd   :  { %82 = dma.hbm_to_vmem [thread:$0]  %s75_s18, 512, %s77_s6, [#allocation9], %s1149_s29, %s1149_s29, %s1150_s30  }
   0xe   :  { %1140 = dma.done.wait [#allocation3], 256  }
   0xf   :  { %1141 = vsyncadd [#allocation3], 4294967040 }
  0x10   :  { %1142 = dma.done.wait [#allocation6], 768  }
  0x11   :  { %1143 = vsyncadd [#allocation6], 4294966528 }
  0x12   :  { %1144 = dma.done.wait [#allocation9], 512  }
  0x13   :  { %1145 = vsyncadd [#allocation9], 4294966784  ;;  %v1250_v0 = vld [vmem:[#allocation2 + $0x8] sm:$0xff]  ;;  %vm109_vm0 = vcmask 261120   ;;  %v1254_v2 = vld [vmem:[#allocation2] sm:$0xff]  ;;  %v1154_v6 = vmov 32.0  }
  0x14   :  { %v108_v1 = vmul.f32 %v1250_v0, %v1250_v0  ;;  %v107_v4 = vmul.f32 %v1254_v2, %v1254_v2  ;;  %962 = vrcp.f32 %v1154_v6  ;;  %v164_v10 = vld [vmem:[%s1468_s3 + $0x18] sm:$0xff]  ;;  %v163_v12 = vld [vmem:[%s1468_s3 + $0x10] sm:$0xff]  ;;  %v162_v14 = vld [vmem:[%s1468_s3 + $0x8] sm:$0xff]  ;;  %vm298_vm6 = vcmask 64512   ;;  %s1156_s24 = smov 104   ;;  %s1157_s25 = smov 120  }
  0x15   :  { %v197_v11 = vld [vmem:[%s1469_s4 + $0x18] sm:$0xff]  ;;  %922 = vmatpush.msra.mxu2 %v164_v10  ;;  %v196_v13 = vld [vmem:[%s1469_s4 + $0x10] sm:$0xff]  ;;  %v195_v15 = vld [vmem:[%s1469_s4 + $0x8] sm:$0xff]  ;;  %183 = vmatpush.msra.mxu0 %v164_v10  ;;  %vm423_vm7 = vcmask 130048   ;;  %s1158_s26 = smov 16   ;;  %s1159_s27 = smov 24  }
  0x16   :  { %v113_v3 = vsel %vm109_vm0, %v108_v1, 0.0  ;;  %v110_v5 = vsel %vm109_vm0, %v107_v4, 0.0  ;;  %926 = vmatpush.msra.mxu3 %v197_v11  ;;  %210 = vmatpush.msra.mxu1 %v197_v11  ;;  %v161_v17 = vld [vmem:[%s1468_s3] sm:$0xff]  ;;  %v224_v23 = vld [vmem:[%s1470_s5 + $0x18] sm:$0xff]  ;;  %v223_v24 = vld [vmem:[%s1470_s5 + $0x10] sm:$0xff]  ;;  %vm656_vm8 = vcmask 195584  }
  0x17   :  { %114 = vadd.xlane.f32.xlu0 %v113_v3  ;;  %923 = vmatpush.msra.mxu2 %v163_v12  ;;  %v194_v18 = vld [vmem:[%s1469_s4] sm:$0xff]  ;;  %v222_v25 = vld [vmem:[%s1470_s5 + $0x8] sm:$0xff]  ;;  %v296_v10 = vld [vmem:[#allocation5] sm:$0xff] }
  0x18   :  { %927 = vmatpush.msra.mxu3 %v196_v13  ;;  %184 = vmatpush.msra.mxu0 %v163_v12  ;;  %v221_v29 = vld [vmem:[%s1470_s5] sm:$0xff] }
  0x19   :  { %211 = vmatpush.msra.mxu1 %v196_v13  ;;  %924 = vmatpush.msra.mxu2 %v162_v14  ;;  %v958_v49 = vld [vmem:[%s1467_s2] ss:$0 sm:$0xff]  ;;  %s1155_s2 = smov 112  }
  0x1a   :  { %v963_v7 = vpop.eup %962  ;;  %928 = vmatpush.msra.mxu3 %v195_v15  ;;  %185 = vmatpush.msra.mxu0 %v162_v14 }
  0x1b   :  { %v117_v8 = vmul.f32 32.0, %v963_v7  ;;  %212 = vmatpush.msra.mxu1 %v195_v15  ;;  %925 = vmatpush.msra.mxu2 %v161_v17  ;;  %vm121_vm1 = vweird.f32 %v963_v7 }
  0x1c   :  { %929 = vmatpush.msra.mxu3 %v194_v18  ;;  %186 = vmatpush.msra.mxu0 %v161_v17 }
  0x1d   :  { %v118_v9 = vsub.f32 1.0, %v117_v8  ;;  %213 = vmatpush.msra.mxu1 %v194_v18  ;;  %237 = vmatpush.msrb.mxu2 %v224_v23 }
  0x1f   :  { %111 = vadd.xlane.f32.xlu0 %v110_v5  ;;  %v119_v16 = vmul.f32 %v963_v7, %v118_v9  ;;  %238 = vmatpush.msrb.mxu2 %v223_v24 }
  0x21   :  { %v120_v19 = vadd.f32 %v963_v7, %v119_v16  ;;  %239 = vmatpush.msrb.mxu2 %v222_v25  ;;  %v297_v16 = vld [vmem:[#allocation5 + $0x8] sm:$0xff] }
  0x23   :  { %v1284_v20 = vsel %vm121_vm1, %v963_v7, %v120_v19  ;;  %240 = vmatpush.msrb.mxu2 %v221_v29 }
  0x8a   :  { %v115_v21 = vpop.xlane.xlu0 %114 }
  0x8b   :  { %v124_v22 = vmul.f32 %v1284_v20, %v115_v21 }
  0x8d   :  { %964 = vrsqrt.f32 %v124_v22  ;;  %vm144_vm2 = vcmp.eq.f32.partialorder %v124_v22, inf  ;;  %v147_v39 = vand.u32 2147483648, %v124_v22  ;;  %vm146_vm3 = vcmp.eq.f32.partialorder %v124_v22, 0.0 }
  0x92   :  { %v112_v26 = vpop.xlane.xlu0 %111 }
  0x93   :  { %v965_v27 = vpop.eup %964  ;;  %v123_v28 = vmul.f32 %v1284_v20, %v112_v26 }
  0x94   :  { %v138_v30 = vmul.f32 %v965_v27, %v124_v22 }
  0x95   :  { %966 = vrsqrt.f32 %v123_v28  ;;  %vm132_vm4 = vcmp.eq.f32.partialorder %v123_v28, inf  ;;  %v135_v47 = vand.u32 2147483648, %v123_v28  ;;  %vm134_vm5 = vcmp.eq.f32.partialorder %v123_v28, 0.0 }
  0x96   :  { %v139_v31 = vmul.f32 %v965_v27, %v138_v30 }
  0x98   :  { %v140_v32 = vmul.f32 0.5, %v139_v31 }
  0x9a   :  { %v141_v33 = vsub.f32 1.5, %v140_v32 }
  0x9b   :  { %v967_v34 = vpop.eup %966 }
  0x9c   :  { %v126_v35 = vmul.f32 %v967_v34, %v123_v28  ;;  %v142_v36 = vmul.f32 %v965_v27, %v141_v33 }
  0x9e   :  { %v143_v37 = vmul.f32 %v142_v36, %v124_v22  ;;  %v127_v38 = vmul.f32 %v967_v34, %v126_v35 }
  0xa0   :  { %v145_v40 = vsel %vm144_vm2, %v124_v22, %v143_v37  ;;  %v128_v41 = vmul.f32 0.5, %v127_v38  ;;  %vm829_vm2 = vcmask 523264  }
  0xa1   :  { %v148_v42 = vsel %vm146_vm3, %v147_v39, %v145_v40 }
  0xa2   :  { %v150_v43 = vadd.f32 1e-08, %v148_v42  ;;  %v129_v44 = vsub.f32 1.5, %v128_v41 }
  0xa4   :  { %968 = vrcp.f32 %v150_v43  ;;  %v130_v45 = vmul.f32 %v967_v34, %v129_v44 }
  0xa6   :  { %v131_v46 = vmul.f32 %v130_v45, %v123_v28 }
  0xa8   :  { %v133_v48 = vsel %vm132_vm4, %v123_v28, %v131_v46 }
  0xa9   :  { %v136_v50 = vsel %vm134_vm5, %v135_v47, %v133_v48 }
  0xaa   :  { %v969_v51 = vpop.eup %968  ;;  %v149_v52 = vadd.f32 1e-08, %v136_v50 }
  0xab   :  { %v155_v53 = vmul.f32 %v969_v51, %v1250_v0 }
  0xac   :  { %970 = vrcp.f32 %v149_v52 }
  0xad   :  { %v160_v54 = vmul.f32 %v958_v49, %v155_v53 }
  0xaf   :  { %885 = vmatmul.msk.f32.vlgmr.msra.gmra.mxu2 %vm109_vm0, %v160_v54  ;;  %887 = vmatmul.msk.f32.vlgmr.msra.gmra.mxu3 %vm109_vm0, %v160_v54 }
  0xb2   :  { %v971_v55 = vpop.eup %970 }
  0xb3   :  { %v154_v56 = vmul.f32 %v971_v55, %v1254_v2 }
  0xb5   :  { %v159_v57 = vmul.f32 %v958_v49, %v154_v56 }
  0xb7   :  { %884 = vmatmul.msk.f32.vlgmr.msra.gmra.mxu0 %vm109_vm0, %v159_v57  ;;  %886 = vmatmul.msk.f32.vlgmr.msra.gmra.mxu1 %vm109_vm0, %v159_v57 }
  0xb8   :  { %888 = vmatmul.msk.f32.vlgmr.msrb.gmra.mxu2 %vm109_vm0, %v159_v57 }
  0xc0   :  { %889 = vmatmul.msk.f32.gmra.mxu2 %vm109_vm0, %v160_v54 }
 0x132   :  { %v191_v58 = vpop.f32.mrf.mxu2  ;;  %v218_v59 = vpop.f32.mrf.mxu3 }
 0x133   :  { %890 = vmatpush.xpose.msk.msrb.mxu3 %vm298_vm6, %v218_v59  ;;  %270 = vrot.lane.b32.xlu0 %v218_v59, %s1155_s2 }
 0x134   :  { %v188_v60 = vpop.f32.mrf.mxu0  ;;  %v215_v61 = vpop.f32.mrf.mxu1 }
 0x135   :  { %272 = vrot.lane.b32.xlu1 %v215_v61, %s1156_s24  ;;  %258 = vrot.lane.b32.xlu2 %v188_v60, %s1156_s24 }
 0x137   :  { %891 = vmatpush.xpose.msk.msrb.mxu3 %vm298_vm6, %v215_v61 }
 0x13a   :  { %892 = vmatmul.msk.f32.vlgmr.msrb.gmra.mxu3 %vm298_vm6, %v188_v60 }
 0x13b   :  { %v1317_v62 = vpop.f32.mrf.mxu2  ;;  %256 = vrot.lane.b32.xlu0 %v191_v58, %s1155_s2 }
 0x13d   :  { %274 = vrot.lane.b32.xlu1 %v218_v59, %s1156_s24  ;;  %266 = vrot.lane.b32.xlu2 %v218_v59, %s1157_s25 }
 0x142   :  { %893 = vmatmul.msk.f32.gmra.mxu3 %vm298_vm6, %v191_v58 }
 0x143   :  { %v1323_v63 = vpop.f32.mrf.mxu2 }
 0x144   :  { %532 = vmatpush.msra.mxu3 %v1323_v63 }
 0x145   :  { %264 = vrot.lane.b32.xlu1 %v215_v61, %s1157_s25  ;;  %260 = vrot.lane.b32.xlu2 %v191_v58, %s1156_s24 }
 0x146   :  { %533 = vmatpush.msra.mxu3 %v1317_v62 }
 0x14d   :  { %268 = vrot.lane.b32.xlu1 %v215_v61, %s1155_s2  ;;  %250 = vrot.lane.b32.xlu2 %v188_v60, %s1157_s25 }
 0x155   :  { %254 = vrot.lane.b32.xlu1 %v188_v60, %s1155_s2  ;;  %252 = vrot.lane.b32.xlu2 %v191_v58, %s1157_s25 }
 0x18f   :  { %v259_v1 = vpop.permute.xlu2 %258 }
 0x197   :  { %v267_v3 = vpop.permute.xlu2 %266 }
 0x198   :  { %894 = vmatpush.xpose.msk.msrb.mxu0 %vm298_vm6, %v267_v3  ;;  %v943_v3 = vpack.i.bf16 %v1317_v62, %v1323_v63 }
 0x19f   :  { %v261_v6 = vpop.permute.xlu2 %260 }
 0x1a5   :  { %v271_v4 = vpop.permute.xlu0 %270 }
 0x1a6   :  { %898 = vmatpush.xpose.msk.msrb.mxu1 %vm298_vm6, %v271_v4 }
 0x1a7   :  { %v273_v5 = vpop.permute.xlu1 %272  ;;  %v251_v9 = vpop.permute.xlu2 %250 }
 0x1ad   :  { %v257_v22 = vpop.permute.xlu0 %256 }
 0x1af   :  { %v275_v7 = vpop.permute.xlu1 %274  ;;  %v253_v15 = vpop.permute.xlu2 %252 }
 0x1b0   :  { %902 = vmatpush.xpose.msk.msra.mxu2 %vm298_vm6, %v275_v7 }
 0x1b4   :  { %903 = vmatpush.xpose.msk.msra.mxu2 %vm298_vm6, %v273_v5 }
 0x1b7   :  { %v265_v8 = vpop.permute.xlu1 %264  ;;  %904 = vmatmul.msk.f32.vlgmr.msra.gmra.mxu2 %vm298_vm6, %v259_v1 }
 0x1b8   :  { %895 = vmatpush.xpose.msk.msrb.mxu0 %vm298_vm6, %v265_v8 }
 0x1bb   :  { %896 = vmatmul.msk.f32.vlgmr.msrb.gmra.mxu0 %vm298_vm6, %v251_v9 }
 0x1bd   :  { %v324_v11 = vpop.f32.mrf.mxu3 }
 0x1be   :  { %v1340_v12 = vadd.f32 %v324_v11, %v296_v10 }
 0x1bf   :  { %v269_v13 = vpop.permute.xlu1 %268  ;;  %905 = vmatmul.msk.f32.gmra.mxu2 %vm298_vm6, %v261_v6 }
 0x1c0   :  { %899 = vmatpush.xpose.msk.msrb.mxu1 %vm298_vm6, %v269_v13  ;;  %v424_v14 = vsel %vm423_vm7, %v1340_v12, -inf }
 0x1c1   :  { %425 = vmax.xlane.f32.xlu2 %v424_v14 }
 0x1c3   :  { %897 = vmatmul.msk.f32.gmra.mxu0 %vm298_vm6, %v253_v15 }
 0x1c5   :  { %v327_v17 = vpop.f32.mrf.mxu3 }
 0x1c6   :  { %v1347_v18 = vadd.f32 %v327_v17, %v297_v16 }
 0x1c7   :  { %v255_v19 = vpop.permute.xlu1 %254 }
 0x1c8   :  { %900 = vmatmul.msk.f32.vlgmr.msrb.gmra.mxu1 %vm298_vm6, %v255_v19  ;;  %v427_v21 = vsel %vm423_vm7, %v1347_v18, -inf }
 0x1c9   :  { %428 = vmax.xlane.f32.xlu1 %v427_v21 }
 0x1d0   :  { %901 = vmatmul.msk.f32.gmra.mxu1 %vm298_vm6, %v257_v22 }
 0x234   :  { %v426_v41 = vpop.xlane.xlu2 %425 }
 0x235   :  { %v448_v8 = vsub.f32 %v1340_v12, %v426_v41 }
 0x237   :  { %v456_v13 = vmul.f32 1.442695, %v448_v8 }
 0x238   :  { %v355_v23 = vpop.f32.mrf.mxu0 }
 0x239   :  { %v356_v24 = vadd.f32 %v355_v23, %v296_v10 }
 0x23a   :  { %v417_v25 = vpop.f32.mrf.mxu2 }
 0x23b   :  { %v418_v26 = vadd.f32 %v417_v25, %v296_v10  ;;  %v430_v27 = vsel %vm423_vm7, %v356_v24, -inf }
 0x23c   :  { %431 = vmax.xlane.f32.xlu2 %v430_v27  ;;  %v429_v42 = vpop.xlane.xlu1 %428 }
 0x23d   :  { %v442_v28 = vsel %vm423_vm7, %v418_v26, -inf  ;;  %v449_v7 = vsub.f32 %v1347_v18, %v429_v42 }
 0x23e   :  { %443 = vmax.xlane.f32.xlu1 %v442_v28 }
 0x23f   :  { %v458_v9 = vmul.f32 1.442695, %v449_v7 }
 0x240   :  { %v358_v29 = vpop.f32.mrf.mxu0 }
 0x241   :  { %v359_v30 = vadd.f32 %v358_v29, %v297_v16 }
 0x242   :  { %v420_v31 = vpop.f32.mrf.mxu2 }
 0x243   :  { %v421_v32 = vadd.f32 %v420_v31, %v297_v16  ;;  %v433_v34 = vsel %vm423_vm7, %v359_v30, -inf }
 0x245   :  { %v386_v33 = vpop.f32.mrf.mxu1  ;;  %v445_v35 = vsel %vm423_vm7, %v421_v32, -inf }
 0x246   :  { %v387_v36 = vadd.f32 %v386_v33, %v296_v10  ;;  %434 = vmax.xlane.f32.xlu1 %v433_v34  ;;  %446 = vmax.xlane.f32.xlu2 %v445_v35 }
 0x248   :  { %v436_v37 = vsel %vm423_vm7, %v387_v36, -inf }
 0x249   :  { %437 = vmax.xlane.f32.xlu0 %v436_v37 }
 0x24d   :  { %v389_v38 = vpop.f32.mrf.mxu1 }
 0x24e   :  { %v390_v39 = vadd.f32 %v389_v38, %v297_v16 }
 0x250   :  { %v439_v40 = vsel %vm423_vm7, %v390_v39, -inf }
 0x251   :  { %440 = vmax.xlane.f32.xlu0 %v439_v40 }
 0x2af   :  { %v432_v43 = vpop.xlane.xlu2 %431 }
 0x2b0   :  { %v450_v44 = vsub.f32 %v356_v24, %v432_v43 }
 0x2b1   :  { %v444_v45 = vpop.xlane.xlu1 %443 }
 0x2b2   :  { %v460_v46 = vmul.f32 1.442695, %v450_v44  ;;  %v454_v47 = vsub.f32 %v418_v26, %v444_v45 }
 0x2b4   :  { %972 = vpow2.f32 %v460_v46  ;;  %v468_v48 = vmul.f32 1.442695, %v454_v47 }
 0x2b6   :  { %974 = vpow2.f32 %v468_v48 }
 0x2b9   :  { %v447_v49 = vpop.xlane.xlu2 %446  ;;  %v435_v4 = vpop.xlane.xlu1 %434 }
 0x2ba   :  { %v1359_v50 = vpop.eup %972  ;;  %v455_v51 = vsub.f32 %v421_v32, %v447_v49  ;;  %v451_v5 = vsub.f32 %v359_v30, %v435_v4 }
 0x2bb   :  { %v478_v52 = vsel %vm423_vm7, %v1359_v50, 0.0 }
 0x2bc   :  { %v1363_v53 = vpop.eup %974  ;;  %v470_v54 = vmul.f32 1.442695, %v455_v51  ;;  %479 = vadd.xlane.f32.xlu2 %v478_v52  ;;  %v438_v55 = vpop.xlane.xlu0 %437  ;;  %v462_v6 = vmul.f32 1.442695, %v451_v5 }
 0x2bd   :  { %v452_v56 = vsub.f32 %v387_v36, %v438_v55  ;;  %v490_v57 = vsel %vm423_vm7, %v1363_v53, 0.0 }
 0x2be   :  { %491 = vadd.xlane.f32.xlu0 %v490_v57  ;;  %976 = vpow2.f32 %v470_v54 }
 0x2bf   :  { %v464_v58 = vmul.f32 1.442695, %v452_v56 }
 0x2c1   :  { %978 = vpow2.f32 %v464_v58 }
 0x2c2   :  { %980 = vpow2.f32 %v462_v6 }
 0x2c3   :  { %982 = vpow2.f32 %v458_v9 }
 0x2c4   :  { %v977_v59 = vpop.eup %976  ;;  %v441_v10 = vpop.xlane.xlu0 %440  ;;  %984 = vpow2.f32 %v456_v13 }
 0x2c5   :  { %v493_v60 = vsel %vm423_vm7, %v977_v59, 0.0  ;;  %v453_v62 = vsub.f32 %v390_v39, %v441_v10 }
 0x2c6   :  { %494 = vadd.xlane.f32.xlu2 %v493_v60  ;;  %v662_v60 = vld [vmem:[#allocation7 + $0x18] sm:$0xff] }
 0x2c7   :  { %v979_v61 = vpop.eup %978  ;;  %v466_v14 = vmul.f32 1.442695, %v453_v62  ;;  %681 = vmatpush.msrb.mxu3 %v662_v60  ;;  %v823_v60 = vld [vmem:[%s1475_s10 + $0x30] sm:$0xff] }
 0x2c8   :  { %v484_v1 = vsel %vm423_vm7, %v979_v61, 0.0  ;;  %v981_v11 = vpop.eup %980 }
 0x2c9   :  { %485 = vadd.xlane.f32.xlu1 %v484_v1  ;;  %v481_v63 = vsel %vm423_vm7, %v981_v11, 0.0  ;;  %v1377_v15 = vpop.eup %982  ;;  %986 = vpow2.f32 %v466_v14  ;;  %v660_v1 = vld [vmem:[#allocation7 + $0x8] sm:$0xff] }
 0x2ca   :  { %v475_v16 = vsel %vm423_vm7, %v1377_v15, 0.0  ;;  %v985_v17 = vpop.eup %984 }
 0x2cb   :  { %v472_v12 = vsel %vm423_vm7, %v985_v17, 0.0 }
 0x2cf   :  { %v987_v18 = vpop.eup %986 }
 0x2d0   :  { %v487_v19 = vsel %vm423_vm7, %v987_v18, 0.0 }
 0x2d2   :  { %944 = vrot.lane.b32.xlu0 %v943_v3, %s1156_s24 }
 0x2de   :  { %954 = vrot.lane.b32.xlu2 %v943_v3, %s1155_s2  ;;  %s1160_s2 = smov [#allocation10]  }
 0x2df   :  { %s867_s24 = sshll.u32 %s1160_s2, 4  ;;  %s868_s24 = int_to_ptr.vmem [resolvable:$true] %s867_s24 }
 0x2e2   :  { %949 = vrot.lane.b32.xlu1 %v943_v3, %s1157_s25  ;;  %v659_v3 = vld [vmem:[#allocation7] sm:$0xff] }
 0x2fc   :  { %482 = vadd.xlane.f32.xlu0 %v481_v63 }
 0x304   :  { %476 = vadd.xlane.f32.xlu0 %v475_v16 }
 0x307   :  { %473 = vadd.xlane.f32.xlu2 %v472_v12 }
 0x30c   :  { %488 = vadd.xlane.f32.xlu1 %v487_v19 }
 0x32f   :  { %v480_v21 = vpop.xlane.xlu2 %479 }
 0x331   :  { %v492_v23 = vpop.xlane.xlu0 %491 }
 0x339   :  { %v495_v22 = vpop.xlane.xlu2 %494 }
 0x33c   :  { %v486_v24 = vpop.xlane.xlu1 %485 }
 0x33d   :  { %988 = vrcp.f32 %v486_v24 }
 0x33e   :  { %990 = vrcp.f32 %v492_v23 }
 0x33f   :  { %992 = vrcp.f32 %v495_v22 }
 0x340   :  { %994 = vrcp.f32 %v480_v21 }
 0x341   :  { %v955_v25 = vpop.permute.xlu2 %954 }
 0x342   :  { %v956_v27 = vunpack.i.l.bf16 %v955_v25  ;;  %v957_v31 = vunpack.i.h.bf16 %v955_v25  ;;  %v743_v25 = vld [vmem:[#allocation8 + $0x18] sm:$0xff] }
 0x343   :  { %v989_v26 = vpop.eup %988 }
 0x344   :  { %v508_v28 = vmul.f32 %v989_v26, %v979_v61  ;;  %v945_v29 = vpop.permute.xlu0 %944  ;;  %v991_v30 = vpop.eup %990  ;;  %590 = vmatpush.msra.mxu1 %v956_v27  ;;  %v661_v61 = vld [vmem:[#allocation7 + $0x10] sm:$0xff]  ;;  %v740_v27 = vld [vmem:[#allocation8] sm:$0xff] }
 0x345   :  { %v946_v32 = vunpack.i.l.bf16 %v945_v29  ;;  %v947_v33 = vunpack.i.h.bf16 %v945_v29  ;;  %v510_v34 = vmul.f32 %v991_v30, %v1363_v53  ;;  %v993_v35 = vpop.eup %992  ;;  %682 = vmatpush.msrb.mxu3 %v661_v61  ;;  %v742_v26 = vld [vmem:[#allocation8 + $0x10] sm:$0xff]  ;;  %v822_v61 = vld [vmem:[%s1475_s10 + $0x28] sm:$0xff] }
 0x346   :  { %591 = vmatpush.msra.mxu1 %v957_v31  ;;  %v511_v36 = vmul.f32 %v993_v35, %v977_v59  ;;  %v995_v38 = vpop.eup %994 }
 0x347   :  { %619 = vmatpush.msrb.mxu2 %v946_v32  ;;  %910 = vmatmul.msk.f32.vlgmr.msra.gmra.mxu1 %vm423_vm7, %v508_v28  ;;  %v506_v41 = vmul.f32 %v995_v38, %v1359_v50 }
 0x348   :  { %683 = vmatpush.msrb.mxu3 %v660_v1  ;;  %v821_v1 = vld [vmem:[%s1475_s10 + $0x20] sm:$0xff] }
 0x349   :  { %620 = vmatpush.msrb.mxu2 %v947_v33 }
 0x34a   :  { %912 = vmatmul.msk.f32.vlgmr.msrb.gmra.mxu2 %vm423_vm7, %v510_v34  ;;  %684 = vmatpush.msrb.mxu3 %v659_v3  ;;  %v820_v3 = vld [vmem:[%s1475_s10 + $0x18] sm:$0xff] }
 0x352   :  { %913 = vmatmul.msk.f32.gmra.mxu2 %vm423_vm7, %v511_v36 }
 0x354   :  { %v950_v37 = vpop.permute.xlu1 %949 }
 0x355   :  { %v951_v39 = vunpack.i.l.bf16 %v950_v37  ;;  %v952_v40 = vunpack.i.h.bf16 %v950_v37 }
 0x357   :  { %561 = vmatpush.msra.mxu0 %v951_v39 }
 0x359   :  { %562 = vmatpush.msra.mxu0 %v952_v40  ;;  %v959_v40 = vld [vmem:[%s1472_s7] ss:$0 sm:$0xff] }
 0x35a   :  { %908 = vmatmul.msk.f32.vlgmr.msra.gmra.mxu0 %vm423_vm7, %v506_v41 }
 0x35b   :  { %766 = vmatpush.msrb.mxu0 %v743_v25 }
 0x35d   :  { %767 = vmatpush.msrb.mxu0 %v742_v26 }
 0x36f   :  { %v483_v42 = vpop.xlane.xlu0 %482 }
 0x370   :  { %996 = vrcp.f32 %v483_v42 }
 0x376   :  { %v997_v43 = vpop.eup %996 }
 0x377   :  { %v507_v44 = vmul.f32 %v997_v43, %v981_v11  ;;  %v477_v46 = vpop.xlane.xlu0 %476 }
 0x379   :  { %909 = vmatmul.msk.f32.gmra.mxu0 %vm423_vm7, %v507_v44 }
 0x37a   :  { %v474_v45 = vpop.xlane.xlu2 %473 }
 0x37b   :  { %998 = vrcp.f32 %v474_v45 }
 0x37f   :  { %v489_v47 = vpop.xlane.xlu1 %488 }
 0x380   :  { %1000 = vrcp.f32 %v489_v47 }
 0x381   :  { %v999_v48 = vpop.eup %998  ;;  %1002 = vrcp.f32 %v477_v46 }
 0x382   :  { %v504_v49 = vmul.f32 %v999_v48, %v985_v17 }
 0x384   :  { %906 = vmatmul.msk.f32.vlgmr.msra.gmra.mxu3 %vm423_vm7, %v504_v49 }
 0x386   :  { %v1001_v50 = vpop.eup %1000 }
 0x387   :  { %v509_v51 = vmul.f32 %v1001_v50, %v987_v18  ;;  %v1003_v52 = vpop.eup %1002 }
 0x388   :  { %v505_v53 = vmul.f32 %v1003_v52, %v1377_v15 }
 0x389   :  { %911 = vmatmul.msk.f32.gmra.mxu1 %vm423_vm7, %v509_v51 }
 0x38c   :  { %907 = vmatmul.msk.f32.gmra.mxu3 %vm423_vm7, %v505_v53 }
 0x3c4   :  { %v593_v54 = vpop.f32.mrf.mxu1 }
 0x3c5   :  { %638 = vrot.lane.b32.xlu1 %v593_v54, %s1158_s26 }
 0x3cd   :  { %v622_v55 = vpop.f32.mrf.mxu2 }
 0x3ce   :  { %646 = vrot.lane.b32.xlu2 %v622_v55, %s1159_s27 }
 0x3d5   :  { %v625_v58 = vpop.f32.mrf.mxu2 }
 0x3d7   :  { %v564_v56 = vpop.f32.mrf.mxu0 }
 0x3d8   :  { %630 = vrot.lane.b32.xlu0 %v564_v56, %s1150_s30 }
 0x3f6   :  { %v567_v57 = vpop.f32.mrf.mxu0 }
 0x3f7   :  { %632 = vrot.lane.b32.xlu0 %v567_v57, %s1150_s30 }
 0x3ff   :  { %648 = vrot.lane.b32.xlu0 %v625_v58, %s1159_s27  ;;  %s869_s27 = sshll.u32 %s1477_s12, 4  ;;  %s870_s27 = int_to_ptr.hbm [resolvable:$true] %s869_s27 }
 0x406   :  { %v596_v59 = vpop.f32.mrf.mxu1 }
 0x407   :  { %640 = vrot.lane.b32.xlu1 %v596_v59, %s1158_s26  ;;  %v535_v4 = vpop.f32.mrf.mxu3 }
 0x40f   :  { %v538_v13 = vpop.f32.mrf.mxu3 }
 0x428   :  { %v647_v8 = vpop.permute.xlu2 %646 }
 0x437   :  { %v639_v6 = vpop.permute.xlu1 %638 }
 0x44a   :  { %v631_v5 = vpop.permute.xlu0 %630 }
 0x44b   :  { %v652_v7 = vsel %vm298_vm6, %v535_v4, %v631_v5  ;;  %v819_v4 = vld [vmem:[%s1475_s10 + $0x10] sm:$0xff]  ;;  %v960_v5 = vld [vmem:[%s1474_s9] ss:$0 sm:$0xff] }
 0x44c   :  { %v654_v9 = vsel %vm423_vm7, %v652_v7, %v639_v6  ;;  %v818_v6 = vld [vmem:[%s1475_s10 + $0x8] sm:$0xff]  ;;  %v817_v7 = vld [vmem:[%s1475_s10] sm:$0xff] }
 0x44d   :  { %v657_v10 = vsel %vm656_vm8, %v654_v9, %v647_v8 }
 0x44e   :  { %914 = vmatmul.msk.f32.vlgmr.msrb.gmra.mxu3 %vm109_vm0, %v657_v10 }
 0x469   :  { %v633_v11 = vpop.permute.xlu0 %632 }
 0x46a   :  { %v653_v62 = vsel %vm298_vm6, %v538_v13, %v633_v11 }
 0x471   :  { %v649_v14 = vpop.permute.xlu0 %648 }
 0x479   :  { %v641_v63 = vpop.permute.xlu1 %640 }
 0x47a   :  { %v655_v15 = vsel %vm423_vm7, %v653_v62, %v641_v63 }
 0x47b   :  { %v658_v16 = vsel %vm656_vm8, %v655_v15, %v649_v14 }
 0x47c   :  { %915 = vmatmul.msk.f32.gmra.mxu3 %vm109_vm0, %v658_v16 }
 0x4d1   :  { %v686_v17 = vpop.f32.mrf.mxu3 }
 0x4d2   :  { %v1403_v12 = vadd.f32 %v686_v17, %v1254_v2  ;;  %v741_v2 = vld [vmem:[#allocation8 + $0x8] sm:$0xff] }
 0x4d3   :  { %768 = vmatpush.msrb.mxu0 %v741_v2 }
 0x4d4   :  { %v694_v18 = vmul.f32 %v1403_v12, %v1403_v12 }
 0x4d5   :  { %769 = vmatpush.msrb.mxu0 %v740_v27 }
 0x4d6   :  { %v696_v19 = vsel %vm109_vm0, %v694_v18, 0.0 }
 0x4d7   :  { %697 = vadd.xlane.f32.xlu2 %v696_v19 }
 0x4ff   :  { %v689_v21 = vpop.f32.mrf.mxu3 }
 0x500   :  { %v1409_v22 = vadd.f32 %v689_v21, %v1250_v0 }
 0x502   :  { %v695_v23 = vmul.f32 %v1409_v22, %v1409_v22 }
 0x504   :  { %v699_v24 = vsel %vm109_vm0, %v695_v23, 0.0 }
 0x505   :  { %700 = vadd.xlane.f32.xlu1 %v699_v24 }
 0x54a   :  { %v698_v28 = vpop.xlane.xlu2 %697 }
 0x54b   :  { %v702_v29 = vmul.f32 %v698_v28, %v1284_v20 }
 0x54d   :  { %1004 = vrsqrt.f32 %v702_v29  ;;  %vm711_vm9 = vcmp.eq.f32.partialorder %v702_v29, inf  ;;  %v714_v36 = vand.u32 2147483648, %v702_v29  ;;  %vm713_vm10 = vcmp.eq.f32.partialorder %v702_v29, 0.0 }
 0x553   :  { %v1005_v0 = vpop.eup %1004 }
 0x554   :  { %v705_v30 = vmul.f32 %v1005_v0, %v702_v29 }
 0x556   :  { %v706_v31 = vmul.f32 %v1005_v0, %v705_v30 }
 0x558   :  { %v707_v32 = vmul.f32 0.5, %v706_v31 }
 0x55a   :  { %v708_v33 = vsub.f32 1.5, %v707_v32 }
 0x55c   :  { %v709_v34 = vmul.f32 %v1005_v0, %v708_v33 }
 0x55e   :  { %v710_v35 = vmul.f32 %v709_v34, %v702_v29 }
 0x560   :  { %v712_v37 = vsel %vm711_vm9, %v702_v29, %v710_v35 }
 0x561   :  { %v715_v38 = vsel %vm713_vm10, %v714_v36, %v712_v37 }
 0x562   :  { %v728_v39 = vadd.f32 1e-08, %v715_v38 }
 0x564   :  { %1006 = vrcp.f32 %v728_v39  ;;  %v961_v39 = vld [vmem:[%s1476_s11] ss:$0 sm:$0xff] }
 0x56a   :  { %v1007_v41 = vpop.eup %1006 }
 0x56b   :  { %v733_v42 = vmul.f32 %v1007_v41, %v1403_v12 }
 0x56d   :  { %v738_v43 = vmul.f32 %v959_v40, %v733_v42 }
 0x56f   :  { %916 = vmatmul.msk.f32.vlgmr.msrb.gmra.mxu0 %vm109_vm0, %v738_v43 }
 0x578   :  { %v701_v44 = vpop.xlane.xlu1 %700 }
 0x579   :  { %v703_v45 = vmul.f32 %v701_v44, %v1284_v20  ;;  %v824_v20 = vld [vmem:[%s1475_s10 + $0x38] sm:$0xff] }
 0x57a   :  { %844 = vmatpush.msrb.mxu1 %v824_v20 }
 0x57b   :  { %1008 = vrsqrt.f32 %v703_v45  ;;  %vm723_vm11 = vcmp.eq.f32.partialorder %v703_v45, inf  ;;  %v726_v53 = vand.u32 2147483648, %v703_v45  ;;  %vm725_vm12 = vcmp.eq.f32.partialorder %v703_v45, 0.0 }
 0x57c   :  { %845 = vmatpush.msrb.mxu1 %v823_v60 }
 0x57e   :  { %846 = vmatpush.msrb.mxu1 %v822_v61 }
 0x580   :  { %847 = vmatpush.msrb.mxu1 %v821_v1 }
 0x581   :  { %v1009_v46 = vpop.eup %1008 }
 0x582   :  { %v717_v47 = vmul.f32 %v1009_v46, %v703_v45  ;;  %848 = vmatpush.msrb.mxu1 %v820_v3 }
 0x584   :  { %v718_v48 = vmul.f32 %v1009_v46, %v717_v47  ;;  %849 = vmatpush.msrb.mxu1 %v819_v4 }
 0x586   :  { %v719_v49 = vmul.f32 0.5, %v718_v48  ;;  %850 = vmatpush.msrb.mxu1 %v818_v6 }
 0x588   :  { %v720_v50 = vsub.f32 1.5, %v719_v49  ;;  %851 = vmatpush.msrb.mxu1 %v817_v7 }
 0x58a   :  { %v721_v51 = vmul.f32 %v1009_v46, %v720_v50 }
 0x58c   :  { %v722_v52 = vmul.f32 %v721_v51, %v703_v45 }
 0x58e   :  { %v724_v54 = vsel %vm723_vm11, %v703_v45, %v722_v52 }
 0x58f   :  { %v727_v55 = vsel %vm725_vm12, %v726_v53, %v724_v54 }
 0x590   :  { %v729_v56 = vadd.f32 1e-08, %v727_v55 }
 0x592   :  { %1010 = vrcp.f32 %v729_v56 }
 0x598   :  { %v1011_v57 = vpop.eup %1010 }
 0x599   :  { %v734_v58 = vmul.f32 %v1011_v57, %v1409_v22 }
 0x59b   :  { %v739_v59 = vmul.f32 %v959_v40, %v734_v58 }
 0x59d   :  { %917 = vmatmul.msk.f32.gmra.mxu0 %vm109_vm0, %v739_v59 }
 0x5ec   :  { %v771_v8 = vpop.f32.mrf.mxu0 }
 0x5ed   :  { %v772_v9 = vadd.f32 %v960_v5, %v771_v8 }
 0x5ef   :  { %v918_v10 = vmul.f32 -1.442695, %v772_v9 }
 0x5f1   :  { %1012 = vpow2.f32 %v918_v10 }
 0x5f7   :  { %v1013_v11 = vpop.eup %1012 }
 0x5f8   :  { %v783_v13 = vadd.f32 1.0, %v1013_v11 }
 0x5fa   :  { %1014 = vrcp.f32 %v783_v13  ;;  %v796_v15 = vand.u32 2147483648, %v783_v13  ;;  %v794_v17 = vand.u32 2147483647, %v783_v13  ;;  %vm790_vm14 = vweird.f32 %v783_v13 }
 0x5fc   :  { %v797_v19 = vor.u32 1.1754944e-38, %v796_v15  ;;  %vm795_vm1 = vcmp.eq.f32.partialorder %v794_v17, 8.507059e+37 }
 0x600   :  { %v1015_v62 = vpop.eup %1014 }
 0x601   :  { %v786_v63 = vmul.f32 %v1015_v62, %v783_v13  ;;  %vm791_vm13 = vweird.f32 %v1015_v62 }
 0x602   :  { %vm792_vm15 = vmor %vm790_vm14, %vm791_vm13 }
 0x603   :  { %v787_v14 = vsub.f32 1.0, %v786_v63 }
 0x605   :  { %v788_v16 = vmul.f32 %v1015_v62, %v787_v14 }
 0x607   :  { %v789_v18 = vadd.f32 %v1015_v62, %v788_v16 }
 0x609   :  { %v793_v21 = vsel %vm792_vm15, %v1015_v62, %v789_v18 }
 0x60a   :  { %v798_v23 = vsel %vm795_vm1, %v797_v19, %v793_v21 }
 0x60b   :  { %v815_v24 = vmul.f32 %v798_v23, %v772_v9 }
 0x60d   :  { %920 = vmatmul.msk.f32.vlgmr.msrb.gmra.mxu1 %vm829_vm2, %v815_v24 }
 0x61a   :  { %v774_v25 = vpop.f32.mrf.mxu0 }
 0x61b   :  { %v775_v26 = vadd.f32 %v960_v5, %v774_v25 }
 0x61d   :  { %v919_v2 = vmul.f32 -1.442695, %v775_v26 }
 0x61f   :  { %1016 = vpow2.f32 %v919_v2 }
 0x625   :  { %v1017_v27 = vpop.eup %1016 }
 0x626   :  { %v784_v28 = vadd.f32 1.0, %v1017_v27 }
 0x628   :  { %1018 = vrcp.f32 %v784_v28  ;;  %v811_v31 = vand.u32 2147483648, %v784_v28  ;;  %v809_v33 = vand.u32 2147483647, %v784_v28  ;;  %vm805_vm4 = vweird.f32 %v784_v28 }
 0x62a   :  { %v812_v35 = vor.u32 1.1754944e-38, %v811_v31  ;;  %vm810_vm6 = vcmp.eq.f32.partialorder %v809_v33, 8.507059e+37 }
 0x62e   :  { %v1019_v29 = vpop.eup %1018 }
 0x62f   :  { %v801_v0 = vmul.f32 %v1019_v29, %v784_v28  ;;  %vm806_vm3 = vweird.f32 %v1019_v29 }
 0x630   :  { %vm807_vm5 = vmor %vm805_vm4, %vm806_vm3 }
 0x631   :  { %v802_v30 = vsub.f32 1.0, %v801_v0 }
 0x633   :  { %v803_v32 = vmul.f32 %v1019_v29, %v802_v30 }
 0x635   :  { %v804_v34 = vadd.f32 %v1019_v29, %v803_v32 }
 0x637   :  { %v808_v36 = vsel %vm807_vm5, %v1019_v29, %v804_v34 }
 0x638   :  { %v813_v37 = vsel %vm810_vm6, %v812_v35, %v808_v36 }
 0x639   :  { %v816_v38 = vmul.f32 %v813_v37, %v775_v26 }
 0x63b   :  { %921 = vmatmul.msk.f32.gmra.mxu1 %vm829_vm2, %v816_v38 }
 0x68a   :  { %v853_v40 = vpop.f32.mrf.mxu1 }
 0x68b   :  { %v854_v41 = vadd.f32 %v961_v39, %v853_v40 }
 0x68d   :  { %v859_v42 = vadd.f32 %v854_v41, %v1403_v12 }
 0x68f   :  { %861 = vst.msk [vmem:[#allocation10] sm:$0xff] %vm109_vm0, %v859_v42 }
 0x6b8   :  { %v856_v43 = vpop.f32.mrf.mxu1 }
 0x6b9   :  { %v857_v44 = vadd.f32 %v961_v39, %v856_v43 }
 0x6bb   :  { %v860_v45 = vadd.f32 %v857_v44, %v1409_v22 }
 0x6bd   :  { %862 = vst.msk [vmem:[#allocation10 + $0x8] sm:$0xff] %vm109_vm0, %v860_v45 }
 0x6be   :  { %875 = dma.vmem_to_hbm [thread:$0]  %s868_s24, 256, %s870_s27, [#allocation4], %s1149_s29, %s1149_s29, %s1150_s30  }
 0x6bf   :  { %1146 = dma.done.wait [#allocation4], 256  }
 0x6c0   :  { %1147 = vsyncadd [#allocation4], 4294967040 }
 0x6c1   :  { %880 = vsyncpa [#allocation3], 1 }
 0x6c2   :  { %881 = vsyncpa [#allocation6], 1 }
 0x6c3   :  { %882 = vsyncpa [#allocation9], 1 }
 0x6c4   :  { %883 = vsyncpa [#allocation4], 1 }

</bundles_post_ra>
